<compile_context>
chip_gen: v5e
topology: v5e:2x2
jax: 0.10.0
libtpu: 0.0.40
codegen_flags: <defaults>
</compile_context>

<pallas_src>
import numpy as np
import jax
import jax.numpy as jnp
from jax.experimental import pallas as pl
from jax.experimental.pallas import tpu as pltpu

# problem sizes (from the PyTorch module / example input x = randn(7, 1, 7, 7))
N, CIN, H, W = 7, 1, 7, 7
COUT, K = 7, 5
STRIDE, PAD, DIL = 2, 3, 2
HOUT = (H - 1) * STRIDE - 2 * PAD + DIL * (K - 1) + 1          # 15
WOUT = (W - 1) * STRIDE - 2 * PAD + DIL * (K - 1) + 1          # 15
PADEQ = DIL * (K - 1) - PAD                                    # 5 (equivalent-conv padding)
SPATIAL = HOUT * WOUT                                          # 225
SPATIAL_PAD = 256                                              # lane-dense per-image width
COUT_PAD = 8                                                   # full sublane tile
KK1 = K * K + 1                                                # 26 (taps + bias row)
TOTAL_LANES = N * SPATIAL_PAD                                  # 1792


def convt_where_kernel(w_ref, p_ref, o_ref):
    # w_ref : VMEM (COUT_PAD, KK1)         flipped weights with bias column, zero-padded rows
    # p_ref : VMEM (KK1, N*SPATIAL_PAD)    im2col patches (+ ones row for bias)
    # o_ref : VMEM (COUT_PAD, N*SPATIAL_PAD)
    acc = jnp.dot(w_ref[...], p_ref[...], preferred_element_type=jnp.float32)  # single MXU matmul
    o_ref[...] = jnp.where(acc > 0, acc, acc * 3.7)                            # fused activation


@jax.jit
def convt_where(x, w, b):
    """x: (N, 1, H, W) f32, w: (1, COUT, K, K) (PyTorch ConvTranspose2d layout), b: (COUT,)."""
    xs = x[:, 0, :, :].astype(jnp.float32)               # (N, H, W), Cin == 1 squeezed
    # single lax.pad: interior padding == stride-2 zero insertion, low/high == PADEQ
    xp = jax.lax.pad(xs, jnp.array(0.0, jnp.float32),
                     ((0, 0, 0),
                      (PADEQ, PADEQ, STRIDE - 1),
                      (PADEQ, PADEQ, STRIDE - 1)))       # (N, 23, 23)
    # im2col: tap (kh, kw) -> dilated shifted window; stack taps on axis 0
    taps = [xp[:, DIL * kh:DIL * kh + HOUT, DIL * kw:DIL * kw + WOUT].reshape(N, SPATIAL)
            for kh in range(K) for kw in range(K)]
    patches = jnp.stack(taps, axis=0)                                    # (25, N, 225)
    patches = jnp.pad(patches, ((0, 0), (0, 0), (0, SPATIAL_PAD - SPATIAL)))  # lane-pad -> 256
    ones_row = jnp.ones((1, N, SPATIAL_PAD), jnp.float32)                # bias row
    patches = jnp.concatenate([patches, ones_row], axis=0)               # (26, N, 256)
    patches = patches.reshape(KK1, TOTAL_LANES)                          # (26, 1792)

    # spatially flipped weights + bias column, padded to 8 output rows
    wf = w[0, :, ::-1, ::-1].reshape(COUT, K * K).astype(jnp.float32)    # (7, 25)
    bf = b.astype(jnp.float32).reshape(COUT, 1)                          # (7, 1)
    wb = jnp.concatenate([wf, bf], axis=1)                               # (7, 26)
    wb = jnp.pad(wb, ((0, COUT_PAD - COUT), (0, 0)))                     # (8, 26)

    out = pl.pallas_call(
        convt_where_kernel,
        out_shape=jax.ShapeDtypeStruct((COUT_PAD, TOTAL_LANES), jnp.float32),
        in_specs=[
            pl.BlockSpec(memory_space=pltpu.MemorySpace.VMEM),   # weights (+bias)
            pl.BlockSpec(memory_space=pltpu.MemorySpace.VMEM),   # im2col patches (+ones)
        ],
        out_specs=pl.BlockSpec(memory_space=pltpu.MemorySpace.VMEM),
    )(wb, patches)

    # cheap post-processing back to NCHW: drop padded rows/lanes, put batch first
    out = out.reshape(COUT_PAD, N, SPATIAL_PAD)[:COUT, :, :SPATIAL]      # (7, N, 225)
    return out.transpose(1, 0, 2).reshape(N, COUT, HOUT, WOUT)


def _numpy_reference(x, w, b):
    """Direct (slow) conv-transpose + where reference for validation."""
    x = np.asarray(x); w = np.asarray(w); b = np.asarray(b)
    out = np.zeros((N, COUT, HOUT, WOUT), np.float32)
    for n in range(N):
        for co in range(COUT):
            for ih in range(H):
                for iw in range(W):
                    v = x[n, 0, ih, iw]
                    for kh in range(K):
                        oh = ih * STRIDE - PAD + kh * DIL
                        if not (0 <= oh < HOUT):
                            continue
                        for kw in range(K):
                            ow = iw * STRIDE - PAD + kw * DIL
                            if 0 <= ow < WOUT:
                                out[n, co, oh, ow] += v * w[0, co, kh, kw]
    out += b[None, :, None, None]
    return np.where(out > 0, out, out * 3.7)


if __name__ == "__main__":
    key = jax.random.PRNGKey(0)
    kx, kw, kb = jax.random.split(key, 3)
    # PyTorch ConvTranspose2d weight layout: (Cin, Cout, K, K)
    x = jax.random.normal(kx, (N, CIN, H, W), dtype=jnp.float32)
    w = jax.random.normal(kw, (CIN, COUT, K, K), dtype=jnp.float32) * 0.2
    b = jax.random.normal(kb, (COUT,), dtype=jnp.float32) * 0.1

    y = convt_where(x, w, b)
    jax.block_until_ready(y)

    y_ref = _numpy_reference(x, w, b)
    np.testing.assert_allclose(np.asarray(y), y_ref, rtol=1e-3, atol=1e-3)
    print("KERNEL_OK")
</pallas_src>

<mosaic_0001>
module attributes {stable_mosaic.version = 11 : i64} {
  func.func @convt_where_kernel(%arg0: memref<8x26xf32, #tpu.memory_space<vmem>>, %arg1: memref<26x1792xf32, #tpu.memory_space<vmem>>, %arg2: memref<8x1792xf32, #tpu.memory_space<vmem>>) attributes {dimension_semantics = [], scalar_prefetch = 0 : i64, scratch_operands = 0 : i64, tpu.core_type = #tpu.core_type<tc>} {
    %c0 = arith.constant 0 : index
    %c0_0 = arith.constant 0 : index
    %0 = vector.load %arg0[%c0, %c0_0] : memref<8x26xf32, #tpu.memory_space<vmem>>, vector<8x26xf32>
    %c0_1 = arith.constant 0 : index
    %c0_2 = arith.constant 0 : index
    %1 = vector.load %arg1[%c0_1, %c0_2] : memref<26x1792xf32, #tpu.memory_space<vmem>>, vector<26x1792xf32>
    %cst = arith.constant dense<0.000000e+00> : vector<8x1792xf32>
    %2 = tpu.matmul %0, %1, %cst {dimension_numbers = #tpu.dot_dimension_numbers<[1], [0], [0], [1], [0, 0, 1, 1], [], []>} : vector<8x26xf32>, vector<26x1792xf32>, vector<8x1792xf32> -> vector<8x1792xf32>
    %cst_3 = arith.constant 0.000000e+00 : f32
    %3 = vector.broadcast %cst_3 : f32 to vector<8x1792xf32>
    %4 = arith.cmpf ogt, %2, %3 : vector<8x1792xf32>
    %cst_4 = arith.constant 3.700000e+00 : f32
    %5 = vector.broadcast %cst_4 : f32 to vector<8x1792xf32>
    %6 = arith.mulf %2, %5 : vector<8x1792xf32>
    %7 = arith.select %4, %2, %6 : vector<8x1792xi1>, vector<8x1792xf32>
    %c0_5 = arith.constant 0 : index
    %c0_6 = arith.constant 0 : index
    %8 = vector.load %arg2[%c0_5, %c0_6] : memref<8x1792xf32, #tpu.memory_space<vmem>>, vector<8x1792xf32>
    tpu.vector_store %arg2[%c0_5, %c0_6], %7 {strides = array<i32>} : memref<8x1792xf32, #tpu.memory_space<vmem>>, vector<8x1792xf32>,
    return
  }
}

</mosaic_0001>

<bundles_post_ra>
// kernel: convt_where.1
= control target key start
LH: loop header
LB: loop body
LE: loop exit
PB: predicated region body
PF: predicated region fallthrough
CT: control target
= control target key end

     0   :  { %vm72_vm0 = vcmask 1041408   ;;  %vm68_vm1 = vcmask 211968   ;;  %s755_s1 = inlined_call_operand.vmem [shape: f32[26,1792], index: 1, kind: input, shape index: {}]   ;;  %s756_s0 = inlined_call_operand.vmem [shape: f32[8,26], index: 0, kind: input, shape index: {}]   ;;  %s757_s2 = inlined_call_operand.vmem [shape: f32[8,1792], index: 2, kind: output, shape index: {}]  }
   0x1   :  { %v54_v0 = vld [vmem:[%s755_s1 + $0x150] sm:$0x3]  ;;  %v55_v1 = vld [vmem:[%s755_s1 + $0x158] sm:$0x3]  ;;  %v56_v2 = vld [vmem:[%s755_s1 + $0x160] sm:$0x3] }
   0x2   :  { %455 = vmatpush.msk.msra.mxu0 %vm72_vm0, %v54_v0  ;;  %457 = vmatpush.msk.msra.mxu1 %vm72_vm0, %v55_v1  ;;  %v57_v3 = vld [vmem:[%s755_s1 + $0x168] sm:$0x3]  ;;  %v40_v4 = vld [vmem:[%s755_s1 + $0xe0] sm:$0xff]  ;;  %v42_v6 = vld [vmem:[%s755_s1 + $0xf0] sm:$0xff] }
   0x3   :  { %v41_v5 = vld [vmem:[%s755_s1 + $0xe8] sm:$0xff]  ;;  %459 = vmatpush.msk.msra.mxu2 %vm72_vm0, %v56_v2  ;;  %461 = vmatpush.msk.msra.mxu3 %vm72_vm0, %v57_v3  ;;  %v43_v7 = vld [vmem:[%s755_s1 + $0xf8] sm:$0xff]  ;;  %v26_v8 = vld [vmem:[%s755_s1 + $0x70] sm:$0xff] }
   0x4   :  { %128 = vmatpush.msra.mxu0 %v40_v4  ;;  %148 = vmatpush.msra.mxu1 %v41_v5  ;;  %v27_v9 = vld [vmem:[%s755_s1 + $0x78] sm:$0xff]  ;;  %v28_v10 = vld [vmem:[%s755_s1 + $0x80] sm:$0xff]  ;;  %v29_v11 = vld [vmem:[%s755_s1 + $0x88] sm:$0xff] }
   0x5   :  { %168 = vmatpush.msra.mxu2 %v42_v6  ;;  %188 = vmatpush.msra.mxu3 %v43_v7  ;;  %v12_v12 = vld [vmem:[%s755_s1] sm:$0xff]  ;;  %v13_v13 = vld [vmem:[%s755_s1 + $0x8] sm:$0xff]  ;;  %v14_v14 = vld [vmem:[%s755_s1 + $0x10] sm:$0xff] }
   0x6   :  { %129 = vmatpush.msra.mxu0 %v26_v8  ;;  %149 = vmatpush.msra.mxu1 %v27_v9  ;;  %v15_v15 = vld [vmem:[%s755_s1 + $0x18] sm:$0xff]  ;;  %v553_v16 = vld [vmem:[%s756_s0] sm:$0xff]  ;;  %v58_v17 = vld [vmem:[%s755_s1 + $0x170] sm:$0x3] }
   0x7   :  { %169 = vmatpush.msra.mxu2 %v28_v10  ;;  %189 = vmatpush.msra.mxu3 %v29_v11  ;;  %v59_v18 = vld [vmem:[%s755_s1 + $0x178] sm:$0x3]  ;;  %v60_v19 = vld [vmem:[%s755_s1 + $0x180] sm:$0x3]  ;;  %v61_v20 = vld [vmem:[%s755_s1 + $0x188] sm:$0x3] }
   0x8   :  { %130 = vmatpush.msra.mxu0 %v12_v12  ;;  %150 = vmatpush.msra.mxu1 %v13_v13  ;;  %v44_v21 = vld [vmem:[%s755_s1 + $0x100] sm:$0xff]  ;;  %v45_v22 = vld [vmem:[%s755_s1 + $0x108] sm:$0xff]  ;;  %v46_v23 = vld [vmem:[%s755_s1 + $0x110] sm:$0xff] }
   0x9   :  { %170 = vmatpush.msra.mxu2 %v14_v14  ;;  %190 = vmatpush.msra.mxu3 %v15_v15  ;;  %v47_v24 = vld [vmem:[%s755_s1 + $0x118] sm:$0xff]  ;;  %v30_v25 = vld [vmem:[%s755_s1 + $0x90] sm:$0xff]  ;;  %v32_v27 = vld [vmem:[%s755_s1 + $0xa0] sm:$0xff] }
   0xa   :  { %456 = vmatmul.msk.f32.vlgmr.msra.gmra.mxu0 %vm68_vm1, %v553_v16  ;;  %458 = vmatmul.msk.f32.vlgmr.msra.gmra.mxu1 %vm68_vm1, %v553_v16  ;;  %v31_v26 = vld [vmem:[%s755_s1 + $0x98] sm:$0xff]  ;;  %v33_v28 = vld [vmem:[%s755_s1 + $0xa8] sm:$0xff]  ;;  %v16_v29 = vld [vmem:[%s755_s1 + $0x20] sm:$0xff] }
   0xb   :  { %460 = vmatmul.msk.f32.vlgmr.msra.gmra.mxu2 %vm68_vm1, %v553_v16  ;;  %462 = vmatmul.msk.f32.vlgmr.msra.gmra.mxu3 %vm68_vm1, %v553_v16  ;;  %v17_v30 = vld [vmem:[%s755_s1 + $0x28] sm:$0xff]  ;;  %v18_v31 = vld [vmem:[%s755_s1 + $0x30] sm:$0xff]  ;;  %v19_v32 = vld [vmem:[%s755_s1 + $0x38] sm:$0xff] }
   0xc   :  { %463 = vmatpush.msk.msrb.mxu0 %vm72_vm0, %v58_v17  ;;  %465 = vmatpush.msk.msrb.mxu1 %vm72_vm0, %v59_v18  ;;  %v62_v33 = vld [vmem:[%s755_s1 + $0x190] sm:$0x3]  ;;  %v63_v34 = vld [vmem:[%s755_s1 + $0x198] sm:$0x3]  ;;  %v64_v35 = vld [vmem:[%s755_s1 + $0x1a0] sm:$0x3] }
   0xd   :  { %467 = vmatpush.msk.msrb.mxu2 %vm72_vm0, %v60_v19  ;;  %469 = vmatpush.msk.msrb.mxu3 %vm72_vm0, %v61_v20  ;;  %v65_v36 = vld [vmem:[%s755_s1 + $0x1a8] sm:$0x3]  ;;  %v48_v37 = vld [vmem:[%s755_s1 + $0x120] sm:$0xff]  ;;  %v50_v39 = vld [vmem:[%s755_s1 + $0x130] sm:$0xff] }
   0xe   :  { %208 = vmatpush.msrb.mxu0 %v44_v21  ;;  %228 = vmatpush.msrb.mxu1 %v45_v22  ;;  %v49_v38 = vld [vmem:[%s755_s1 + $0x128] sm:$0xff]  ;;  %v51_v40 = vld [vmem:[%s755_s1 + $0x138] sm:$0xff]  ;;  %v34_v41 = vld [vmem:[%s755_s1 + $0xb0] sm:$0xff] }
   0xf   :  { %248 = vmatpush.msrb.mxu2 %v46_v23  ;;  %268 = vmatpush.msrb.mxu3 %v47_v24  ;;  %v35_v42 = vld [vmem:[%s755_s1 + $0xb8] sm:$0xff]  ;;  %v36_v43 = vld [vmem:[%s755_s1 + $0xc0] sm:$0xff]  ;;  %v37_v44 = vld [vmem:[%s755_s1 + $0xc8] sm:$0xff] }
  0x10   :  { %209 = vmatpush.msrb.mxu0 %v30_v25  ;;  %229 = vmatpush.msrb.mxu1 %v31_v26  ;;  %v20_v45 = vld [vmem:[%s755_s1 + $0x40] sm:$0xff]  ;;  %v21_v46 = vld [vmem:[%s755_s1 + $0x48] sm:$0xff]  ;;  %v22_v47 = vld [vmem:[%s755_s1 + $0x50] sm:$0xff] }
  0x11   :  { %249 = vmatpush.msrb.mxu2 %v32_v27  ;;  %269 = vmatpush.msrb.mxu3 %v33_v28  ;;  %v23_v48 = vld [vmem:[%s755_s1 + $0x58] sm:$0xff]  ;;  %v66_v49 = vld [vmem:[%s755_s1 + $0x1b0] sm:$0x3]  ;;  %v52_v51 = vld [vmem:[%s755_s1 + $0x140] sm:$0xff] }
  0x12   :  { %210 = vmatpush.msrb.mxu0 %v16_v29  ;;  %230 = vmatpush.msrb.mxu1 %v17_v30  ;;  %v67_v50 = vld [vmem:[%s755_s1 + $0x1b8] sm:$0x3]  ;;  %v53_v52 = vld [vmem:[%s755_s1 + $0x148] sm:$0xff]  ;;  %v38_v53 = vld [vmem:[%s755_s1 + $0xd0] sm:$0xff] }
  0x13   :  { %250 = vmatpush.msrb.mxu2 %v18_v31  ;;  %270 = vmatpush.msrb.mxu3 %v19_v32  ;;  %v39_v54 = vld [vmem:[%s755_s1 + $0xd8] sm:$0xff]  ;;  %v24_v55 = vld [vmem:[%s755_s1 + $0x60] sm:$0xff]  ;;  %v25_v56 = vld [vmem:[%s755_s1 + $0x68] sm:$0xff] }
  0x14   :  { %464 = vmatmul.msk.f32.vlgmr.msrb.gmra.mxu0 %vm68_vm1, %v553_v16  ;;  %466 = vmatmul.msk.f32.vlgmr.msrb.gmra.mxu1 %vm68_vm1, %v553_v16 }
  0x15   :  { %468 = vmatmul.msk.f32.vlgmr.msrb.gmra.mxu2 %vm68_vm1, %v553_v16  ;;  %470 = vmatmul.msk.f32.vlgmr.msrb.gmra.mxu3 %vm68_vm1, %v553_v16 }
  0x16   :  { %471 = vmatpush.msk.msra.mxu0 %vm72_vm0, %v62_v33  ;;  %473 = vmatpush.msk.msra.mxu1 %vm72_vm0, %v63_v34 }
  0x17   :  { %475 = vmatpush.msk.msra.mxu2 %vm72_vm0, %v64_v35  ;;  %477 = vmatpush.msk.msra.mxu3 %vm72_vm0, %v65_v36 }
  0x18   :  { %288 = vmatpush.msra.mxu0 %v48_v37  ;;  %308 = vmatpush.msra.mxu1 %v49_v38 }
  0x19   :  { %328 = vmatpush.msra.mxu2 %v50_v39  ;;  %348 = vmatpush.msra.mxu3 %v51_v40 }
  0x1a   :  { %289 = vmatpush.msra.mxu0 %v34_v41  ;;  %309 = vmatpush.msra.mxu1 %v35_v42 }
  0x1b   :  { %329 = vmatpush.msra.mxu2 %v36_v43  ;;  %349 = vmatpush.msra.mxu3 %v37_v44 }
  0x1c   :  { %290 = vmatpush.msra.mxu0 %v20_v45  ;;  %310 = vmatpush.msra.mxu1 %v21_v46 }
  0x1d   :  { %330 = vmatpush.msra.mxu2 %v22_v47  ;;  %350 = vmatpush.msra.mxu3 %v23_v48 }
  0x1e   :  { %472 = vmatmul.msk.f32.vlgmr.msra.gmra.mxu0 %vm68_vm1, %v553_v16  ;;  %474 = vmatmul.msk.f32.vlgmr.msra.gmra.mxu1 %vm68_vm1, %v553_v16 }
  0x1f   :  { %476 = vmatmul.msk.f32.vlgmr.msra.gmra.mxu2 %vm68_vm1, %v553_v16  ;;  %478 = vmatmul.msk.f32.vlgmr.msra.gmra.mxu3 %vm68_vm1, %v553_v16 }
  0x20   :  { %479 = vmatpush.msk.msrb.mxu0 %vm72_vm0, %v66_v49  ;;  %481 = vmatpush.msk.msrb.mxu1 %vm72_vm0, %v67_v50 }
  0x22   :  { %368 = vmatpush.msrb.mxu0 %v52_v51  ;;  %388 = vmatpush.msrb.mxu1 %v53_v52 }
  0x24   :  { %369 = vmatpush.msrb.mxu0 %v38_v53  ;;  %389 = vmatpush.msrb.mxu1 %v39_v54 }
  0x26   :  { %370 = vmatpush.msrb.mxu0 %v24_v55  ;;  %390 = vmatpush.msrb.mxu1 %v25_v56 }
  0x27   :  { %480 = vmatmul.msk.f32.vlgmr.msrb.gmra.mxu0 %vm68_vm1, %v553_v16  ;;  %482 = vmatmul.msk.f32.vlgmr.msrb.gmra.mxu1 %vm68_vm1, %v553_v16 }
  0x87   :  { %v132_v57 = vpop.f32.mrf.mxu0  ;;  %v152_v58 = vpop.f32.mrf.mxu1 }
  0x88   :  { %vm395_vm2 = vcmp.gt.f32.partialorder %v132_v57, 0.0  ;;  %v409_v59 = vmul.f32 3.7, %v132_v57  ;;  %vm396_vm3 = vcmp.gt.f32.partialorder %v152_v58, 0.0  ;;  %v410_v60 = vmul.f32 3.7, %v152_v58 }
  0x8a   :  { %v423_v61 = vsel %vm395_vm2, %v132_v57, %v409_v59  ;;  %v424_v62 = vsel %vm396_vm3, %v152_v58, %v410_v60 }
  0x8b   :  { %437 = vst [vmem:[%s757_s2] sm:$0xff] %v423_v61 }
  0x8c   :  { %438 = vst [vmem:[%s757_s2 + $0x8] sm:$0xff] %v424_v62 }
  0x8e   :  { %v172_v63 = vpop.f32.mrf.mxu2  ;;  %v192_v0 = vpop.f32.mrf.mxu3 }
  0x8f   :  { %vm397_vm4 = vcmp.gt.f32.partialorder %v172_v63, 0.0  ;;  %v411_v1 = vmul.f32 3.7, %v172_v63  ;;  %vm398_vm5 = vcmp.gt.f32.partialorder %v192_v0, 0.0  ;;  %v412_v2 = vmul.f32 3.7, %v192_v0 }
  0x91   :  { %v425_v3 = vsel %vm397_vm4, %v172_v63, %v411_v1  ;;  %v426_v4 = vsel %vm398_vm5, %v192_v0, %v412_v2  ;;  %v212_v5 = vpop.f32.mrf.mxu0  ;;  %v232_v6 = vpop.f32.mrf.mxu1 }
  0x92   :  { %439 = vst [vmem:[%s757_s2 + $0x10] sm:$0xff] %v425_v3  ;;  %vm399_vm6 = vcmp.gt.f32.partialorder %v212_v5, 0.0  ;;  %v413_v7 = vmul.f32 3.7, %v212_v5  ;;  %vm400_vm7 = vcmp.gt.f32.partialorder %v232_v6, 0.0 }
  0x93   :  { %440 = vst [vmem:[%s757_s2 + $0x18] sm:$0xff] %v426_v4  ;;  %v414_v8 = vmul.f32 3.7, %v232_v6 }
  0x94   :  { %v427_v9 = vsel %vm399_vm6, %v212_v5, %v413_v7 }
  0x95   :  { %441 = vst [vmem:[%s757_s2 + $0x20] sm:$0xff] %v427_v9  ;;  %v428_v10 = vsel %vm400_vm7, %v232_v6, %v414_v8 }
  0x96   :  { %442 = vst [vmem:[%s757_s2 + $0x28] sm:$0xff] %v428_v10 }
  0x98   :  { %v252_v11 = vpop.f32.mrf.mxu2  ;;  %v272_v12 = vpop.f32.mrf.mxu3 }
  0x99   :  { %vm401_vm8 = vcmp.gt.f32.partialorder %v252_v11, 0.0  ;;  %v415_v13 = vmul.f32 3.7, %v252_v11  ;;  %vm402_vm9 = vcmp.gt.f32.partialorder %v272_v12, 0.0  ;;  %v416_v14 = vmul.f32 3.7, %v272_v12 }
  0x9b   :  { %v429_v15 = vsel %vm401_vm8, %v252_v11, %v415_v13  ;;  %v430_v16 = vsel %vm402_vm9, %v272_v12, %v416_v14  ;;  %v292_v17 = vpop.f32.mrf.mxu0  ;;  %v312_v18 = vpop.f32.mrf.mxu1 }
  0x9c   :  { %443 = vst [vmem:[%s757_s2 + $0x30] sm:$0xff] %v429_v15  ;;  %vm403_vm10 = vcmp.gt.f32.partialorder %v292_v17, 0.0  ;;  %v417_v19 = vmul.f32 3.7, %v292_v17  ;;  %vm404_vm11 = vcmp.gt.f32.partialorder %v312_v18, 0.0 }
  0x9d   :  { %444 = vst [vmem:[%s757_s2 + $0x38] sm:$0xff] %v430_v16  ;;  %v418_v20 = vmul.f32 3.7, %v312_v18 }
  0x9e   :  { %v431_v21 = vsel %vm403_vm10, %v292_v17, %v417_v19 }
  0x9f   :  { %445 = vst [vmem:[%s757_s2 + $0x40] sm:$0xff] %v431_v21  ;;  %v432_v22 = vsel %vm404_vm11, %v312_v18, %v418_v20 }
  0xa0   :  { %446 = vst [vmem:[%s757_s2 + $0x48] sm:$0xff] %v432_v22 }
  0xa2   :  { %v332_v23 = vpop.f32.mrf.mxu2  ;;  %v352_v24 = vpop.f32.mrf.mxu3 }
  0xa3   :  { %vm405_vm12 = vcmp.gt.f32.partialorder %v332_v23, 0.0  ;;  %v419_v25 = vmul.f32 3.7, %v332_v23  ;;  %vm406_vm13 = vcmp.gt.f32.partialorder %v352_v24, 0.0  ;;  %v420_v26 = vmul.f32 3.7, %v352_v24 }
  0xa4   :  { %v372_v27 = vpop.f32.mrf.mxu0  ;;  %v392_v28 = vpop.f32.mrf.mxu1 }
  0xa5   :  { %v433_v29 = vsel %vm405_vm12, %v332_v23, %v419_v25  ;;  %v434_v30 = vsel %vm406_vm13, %v352_v24, %v420_v26  ;;  %vm407_vm14 = vcmp.gt.f32.partialorder %v372_v27, 0.0  ;;  %v421_v31 = vmul.f32 3.7, %v372_v27 }
  0xa6   :  { %447 = vst [vmem:[%s757_s2 + $0x50] sm:$0xff] %v433_v29  ;;  %vm408_vm15 = vcmp.gt.f32.partialorder %v392_v28, 0.0  ;;  %v422_v32 = vmul.f32 3.7, %v392_v28 }
  0xa7   :  { %448 = vst [vmem:[%s757_s2 + $0x58] sm:$0xff] %v434_v30  ;;  %v435_v33 = vsel %vm407_vm14, %v372_v27, %v421_v31 }
  0xa8   :  { %449 = vst [vmem:[%s757_s2 + $0x60] sm:$0xff] %v435_v33  ;;  %v436_v34 = vsel %vm408_vm15, %v392_v28, %v422_v32 }
  0xa9   :  { %450 = vst [vmem:[%s757_s2 + $0x68] sm:$0xff] %v436_v34 }

</bundles_post_ra>
